<compile_context>
chip_gen: v7x
topology: tpu7x:2x2x1
jax: 0.10.0
libtpu: 0.0.40
codegen_flags: <defaults>
</compile_context>

<pallas_src>
import functools

import jax
import jax.numpy as jnp
from jax.experimental import pallas as pl
from jax.experimental.pallas import tpu as pltpu


# Rows per grid step; multiple of 128 keeps blocks lane-dense.  8192 rows of
# f32 state (lane-padded 16 -> 128) is ~4 MiB/buffer, ~8 MiB double-buffered,
# plus ~2-3 MiB of (32, tile_b) f32 intermediates: fits every generation.
_TILE_B_MAX = 8192


def _round_up(x, m):
    return ((x + m - 1) // m) * m


def _choose_tile_b(B):
    b128 = _round_up(max(B, 1), 128)   # lane-dense blocks even for tiny B
    if b128 <= 128:
        return 128                     # tiny batch: a single lane-dense tile
    # >= 2 grid steps so both v7x TensorCores get work; cap per-step rows so
    # the double-buffered state block + intermediates stay inside the scoped
    # VMEM budget on every generation.
    half = _round_up((b128 + 1) // 2, 128)
    return min(_TILE_B_MAX, half)


def _nda_kernel(state_ref,   # (TILE_B, nS)   f32
                action_ref,  # (1, TILE_B)    f32  (lane-dense)
                w1t_ref,     # (H1, nS)       fc1 weight, transposed
                b1t_ref,     # (H1, 1)
                w2t_ref,     # (H2, 1)        fc2 weight, transposed
                b2t_ref,     # (H2, 1)
                w3at_ref,    # (1, H1)        fc3 weight rows [:H1], transposed
                w3bt_ref,    # (1, H2)        fc3 weight rows [H1:], transposed
                b3_ref,      # (1,)           SMEM scalar
                out_ref):    # (1, TILE_B)
    # fc1 (transposed dataflow): h1t[h, b] = sum_s w1t[h, s] * state[b, s].
    # Contraction on the last dim of both operands -> MXU with batch on lanes.
    h1t = jax.lax.dot_general(
        w1t_ref[...], state_ref[...],
        dimension_numbers=(((1,), (1,)), ((), ())),
        preferred_element_type=jnp.float32)                      # (H1, TILE_B)
    h1t = jnp.maximum(h1t + b1t_ref[...], 0.0)

    # fc2 has K == 1: it is just a rank-1 outer product; keep it on the VPU.
    h2t = jnp.maximum(w2t_ref[...] * action_ref[...] + b2t_ref[...], 0.0)  # (H2, TILE_B)

    # fc3 over the virtual concat [h1 | h2]; MXU, lane-dense (1, TILE_B) output.
    out = (jnp.dot(w3at_ref[...], h1t, preferred_element_type=jnp.float32)
           + jnp.dot(w3bt_ref[...], h2t, preferred_element_type=jnp.float32)
           + b3_ref[0])
    out_ref[...] = out.astype(out_ref.dtype)


@functools.partial(jax.jit, static_argnames=("nS",))
def non_dominated_approximator_forward(state, point, action, params, nS):
    """Pallas-backed forward.  `point` is accepted for API parity but unused,
    exactly like the PyTorch forward (which only reshapes it)."""
    del point  # reshaped-but-unused in the reference module; dead work otherwise.

    state = jnp.asarray(state).reshape(-1, nS).astype(jnp.float32)
    action = jnp.asarray(action).reshape(-1, 1).astype(jnp.float32)
    B = state.shape[0]

    H1 = params["w1"].shape[1]   # fc1 hidden width (32 in the module)
    H2 = params["w2"].shape[1]   # fc2 hidden width (32 in the module)

    tile_b = _choose_tile_b(B)
    num_tiles = pl.cdiv(B, tile_b)   # ragged tail handled by block clipping

    # (B, 1) -> (1, B): contiguous reshape (no copy), batch onto the lane axis.
    action_t = action.reshape(1, B)

    # Small, one-time weight re-layouts for the transposed dataflow.
    w1t = params["w1"].T                        # (H1, nS)
    b1t = params["b1"].reshape(H1, 1)           # (H1, 1)
    w2t = params["w2"].reshape(H2, 1)           # (H2, 1)
    b2t = params["b2"].reshape(H2, 1)           # (H2, 1)
    w3at = params["w3"][:H1, :].reshape(1, H1)  # (1, H1)
    w3bt = params["w3"][H1:, :].reshape(1, H2)  # (1, H2)
    b3 = params["b3"].reshape(1)                # scalar -> SMEM

    # Scheduler hint for XLA: tiny compute, B*(nS+2)*4 bytes of HBM traffic.
    flops = B * (2 * nS * H1 + 4 * H1 + 5 * H2 + 1)
    bytes_accessed = (B * (nS + 2) * 4
                      + (nS * H1 + 2 * H1 + 3 * H2 + 1) * 4)

    grid_spec = pltpu.PrefetchScalarGridSpec(
        num_scalar_prefetch=0,
        grid=(num_tiles,),
        in_specs=[
            pl.BlockSpec((tile_b, nS), lambda i: (i, 0)),        # state tile
            pl.BlockSpec((1, tile_b), lambda i: (0, i)),         # action tile (lanes)
            pl.BlockSpec((H1, nS), lambda i: (0, 0)),            # w1^T  (resident)
            pl.BlockSpec((H1, 1), lambda i: (0, 0)),             # b1^T
            pl.BlockSpec((H2, 1), lambda i: (0, 0)),             # w2^T
            pl.BlockSpec((H2, 1), lambda i: (0, 0)),             # b2^T
            pl.BlockSpec((1, H1), lambda i: (0, 0)),             # w3[:H1]^T
            pl.BlockSpec((1, H2), lambda i: (0, 0)),             # w3[H1:]^T
            pl.BlockSpec(memory_space=pltpu.MemorySpace.SMEM),   # b3 scalar
        ],
        out_specs=pl.BlockSpec((1, tile_b), lambda i: (0, i)),   # lane-dense output
    )

    out_t = pl.pallas_call(
        _nda_kernel,
        out_shape=jax.ShapeDtypeStruct((1, B), jnp.float32),
        grid_spec=grid_spec,
        compiler_params=pltpu.CompilerParams(
            dimension_semantics=("parallel",),
            vmem_limit_bytes=32 * 1024 * 1024),
        cost_estimate=pl.CostEstimate(
            flops=flops, transcendentals=0, bytes_accessed=bytes_accessed),
    )(state, action_t, w1t, b1t, w2t, b2t, w3at, w3bt, b3)

    # (1, B) -> (B, 1)
    return out_t.reshape(B, 1)


def init_params(nS, key):
    """Deterministic parameter init (PyTorch-style uniform fan-in bound)."""
    ks = jax.random.split(key, 6)

    def linear(kw, kb, fan_in, fan_out):
        bound = 1.0 / jnp.sqrt(jnp.float32(fan_in))
        w = jax.random.uniform(kw, (fan_in, fan_out), jnp.float32, -bound, bound)
        b = jax.random.uniform(kb, (1, fan_out), jnp.float32, -bound, bound)
        return w, b

    w1, b1 = linear(ks[0], ks[1], nS, 32)   # fc1: Linear(nS, 32)
    w2, b2 = linear(ks[2], ks[3], 1, 32)    # fc2: Linear(1, 32)
    w3, b3 = linear(ks[4], ks[5], 64, 1)    # fc3: Linear(64, 1)
    return {"w1": w1, "b1": b1, "w2": w2, "b2": b2, "w3": w3, "b3": b3}


def _reference_forward(state, point, action, params, nS):
    del point
    state = state.reshape(-1, nS).astype(jnp.float32)
    action = action.reshape(-1, 1).astype(jnp.float32)
    h1 = jax.nn.relu(state @ params["w1"] + params["b1"])
    h2 = jax.nn.relu(action @ params["w2"] + params["b2"])
    cat = jnp.concatenate([h1, h2], axis=1)
    return cat @ params["w3"] + params["b3"]


if __name__ == "__main__":
    nS, nA, nO = 16, 4, 2

    key = jax.random.PRNGKey(0)
    k_state, k_point, k_action, k_params, k_big = jax.random.split(key, 5)
    params = init_params(nS, k_params)

    # Small example consistent with the module (single lane-dense 128-row tile,
    # ragged tail handled by block clipping).
    B = 8
    state = jax.random.normal(k_state, (B, nS), jnp.float32)
    point = jax.random.normal(k_point, (B, 1), jnp.float32)
    action = jax.random.randint(k_action, (B, 1), 0, nA).astype(jnp.float32)

    out = non_dominated_approximator_forward(state, point, action, params, nS)
    out = jax.block_until_ready(out)
    ref = _reference_forward(state, point, action, params, nS)
    assert out.shape == (B, 1), out.shape
    assert jnp.allclose(out, ref, atol=1e-5, rtol=1e-5), (out, ref)

    # Multi-tile + ragged-tail path: 2 grid steps of 640 rows, no jnp.pad,
    # the clipped last block drops the out-of-bounds lanes on writeback.
    B2 = 1219
    kb1, kb2, kb3 = jax.random.split(k_big, 3)
    state2 = jax.random.normal(kb1, (B2, nS), jnp.float32)
    point2 = jax.random.normal(kb2, (B2, 1), jnp.float32)
    action2 = jax.random.randint(kb3, (B2, 1), 0, nA).astype(jnp.float32)

    out2 = non_dominated_approximator_forward(state2, point2, action2, params, nS)
    out2 = jax.block_until_ready(out2)
    ref2 = _reference_forward(state2, point2, action2, params, nS)
    assert out2.shape == (B2, 1), out2.shape
    assert jnp.allclose(out2, ref2, atol=1e-4, rtol=1e-4)

    print("KERNEL_OK")
</pallas_src>

<mosaic_0001>
module attributes {stable_mosaic.version = 11 : i64} {
  func.func @_nda_kernel(%arg0: i32, %arg1: memref<128x16xf32, #tpu.memory_space<vmem>>, %arg2: memref<1x128xf32, #tpu.memory_space<vmem>>, %arg3: memref<32x16xf32, #tpu.memory_space<vmem>>, %arg4: memref<32x1xf32, #tpu.memory_space<vmem>>, %arg5: memref<32x1xf32, #tpu.memory_space<vmem>>, %arg6: memref<32x1xf32, #tpu.memory_space<vmem>>, %arg7: memref<1x32xf32, #tpu.memory_space<vmem>>, %arg8: memref<1x32xf32, #tpu.memory_space<vmem>>, %arg9: memref<1xf32, #tpu.memory_space<smem>>, %arg10: memref<1x128xf32, #tpu.memory_space<vmem>>) attributes {dimension_semantics = [#tpu.dimension_semantics<parallel>], iteration_bounds = array<i64: 1>, scalar_prefetch = 0 : i64, scratch_operands = 0 : i64, tpu.core_type = #tpu.core_type<tc>, window_params = [{transform_indices = @transform_0, window_bounds = array<i64: 128, 16>}, {transform_indices = @transform_1, window_bounds = array<i64: 1, 128>}, {pipeline_mode = #tpu.pipeline_mode<synchronous>, transform_indices = @transform_2, window_bounds = array<i64: 32, 16>}, {pipeline_mode = #tpu.pipeline_mode<synchronous>, transform_indices = @transform_3, window_bounds = array<i64: 32, 1>}, {pipeline_mode = #tpu.pipeline_mode<synchronous>, transform_indices = @transform_4, window_bounds = array<i64: 32, 1>}, {pipeline_mode = #tpu.pipeline_mode<synchronous>, transform_indices = @transform_5, window_bounds = array<i64: 32, 1>}, {pipeline_mode = #tpu.pipeline_mode<synchronous>, transform_indices = @transform_6, window_bounds = array<i64: 1, 32>}, {pipeline_mode = #tpu.pipeline_mode<synchronous>, transform_indices = @transform_7, window_bounds = array<i64: 1, 32>}, {transform_indices = @transform_8, window_bounds = array<i64: 1>}, {transform_indices = @transform_9, window_bounds = array<i64: 1, 128>}]} {
    %c0 = arith.constant 0 : index
    %c0_0 = arith.constant 0 : index
    %0 = vector.load %arg3[%c0, %c0_0] : memref<32x16xf32, #tpu.memory_space<vmem>>, vector<32x16xf32>
    %c0_1 = arith.constant 0 : index
    %c0_2 = arith.constant 0 : index
    %1 = vector.load %arg1[%c0_1, %c0_2] : memref<128x16xf32, #tpu.memory_space<vmem>>, vector<128x16xf32>
    %cst = arith.constant dense<0.000000e+00> : vector<32x128xf32>
    %2 = tpu.matmul %0, %1, %cst {dimension_numbers = #tpu.dot_dimension_numbers<[1], [1], [0], [0], [0, 0, 1, 0], [], []>} : vector<32x16xf32>, vector<128x16xf32>, vector<32x128xf32> -> vector<32x128xf32>
    %c0_3 = arith.constant 0 : index
    %c0_4 = arith.constant 0 : index
    %3 = vector.load %arg4[%c0_3, %c0_4] : memref<32x1xf32, #tpu.memory_space<vmem>>, vector<32x1xf32>
    %4 = vector.broadcast %3 : vector<32x1xf32> to vector<32x128xf32>
    %5 = arith.addf %2, %4 : vector<32x128xf32>
    %cst_5 = arith.constant 0.000000e+00 : f32
    %6 = vector.broadcast %cst_5 : f32 to vector<32x128xf32>
    %7 = arith.maximumf %5, %6 : vector<32x128xf32>
    %c0_6 = arith.constant 0 : index
    %c0_7 = arith.constant 0 : index
    %8 = vector.load %arg5[%c0_6, %c0_7] : memref<32x1xf32, #tpu.memory_space<vmem>>, vector<32x1xf32>
    %c0_8 = arith.constant 0 : index
    %c0_9 = arith.constant 0 : index
    %9 = vector.load %arg2[%c0_8, %c0_9] : memref<1x128xf32, #tpu.memory_space<vmem>>, vector<1x128xf32>
    %10 = vector.broadcast %8 : vector<32x1xf32> to vector<32x128xf32>
    %11 = vector.broadcast %9 : vector<1x128xf32> to vector<32x128xf32>
    %12 = arith.mulf %10, %11 : vector<32x128xf32>
    %c0_10 = arith.constant 0 : index
    %c0_11 = arith.constant 0 : index
    %13 = vector.load %arg6[%c0_10, %c0_11] : memref<32x1xf32, #tpu.memory_space<vmem>>, vector<32x1xf32>
    %14 = vector.broadcast %13 : vector<32x1xf32> to vector<32x128xf32>
    %15 = arith.addf %12, %14 : vector<32x128xf32>
    %cst_12 = arith.constant 0.000000e+00 : f32
    %16 = vector.broadcast %cst_12 : f32 to vector<32x128xf32>
    %17 = arith.maximumf %15, %16 : vector<32x128xf32>
    %c0_13 = arith.constant 0 : index
    %c0_14 = arith.constant 0 : index
    %18 = vector.load %arg7[%c0_13, %c0_14] : memref<1x32xf32, #tpu.memory_space<vmem>>, vector<1x32xf32>
    %cst_15 = arith.constant dense<0.000000e+00> : vector<1x128xf32>
    %19 = tpu.matmul %18, %7, %cst_15 {dimension_numbers = #tpu.dot_dimension_numbers<[1], [0], [0], [1], [0, 0, 1, 1], [], []>} : vector<1x32xf32>, vector<32x128xf32>, vector<1x128xf32> -> vector<1x128xf32>
    %c0_16 = arith.constant 0 : index
    %c0_17 = arith.constant 0 : index
    %20 = vector.load %arg8[%c0_16, %c0_17] : memref<1x32xf32, #tpu.memory_space<vmem>>, vector<1x32xf32>
    %cst_18 = arith.constant dense<0.000000e+00> : vector<1x128xf32>
    %21 = tpu.matmul %20, %17, %cst_18 {dimension_numbers = #tpu.dot_dimension_numbers<[1], [0], [0], [1], [0, 0, 1, 1], [], []>} : vector<1x32xf32>, vector<32x128xf32>, vector<1x128xf32> -> vector<1x128xf32>
    %22 = arith.addf %19, %21 : vector<1x128xf32>
    %c0_19 = arith.constant 0 : index
    %23 = memref.load %arg9[%c0_19] : memref<1xf32, #tpu.memory_space<smem>>
    %24 = vector.broadcast %23 : f32 to vector<1x128xf32>
    %25 = arith.addf %22, %24 : vector<1x128xf32>
    %c0_20 = arith.constant 0 : index
    %c0_21 = arith.constant 0 : index
    %26 = vector.load %arg10[%c0_20, %c0_21] : memref<1x128xf32, #tpu.memory_space<vmem>>, vector<1x128xf32>
    tpu.vector_store %arg10[%c0_20, %c0_21], %25 {strides = array<i32>} : memref<1x128xf32, #tpu.memory_space<vmem>>, vector<1x128xf32>,
    return
  }
  func.func @transform_0(%arg0: i32) -> (i32, i32) {
    %c0_i32 = arith.constant 0 : i32
    %c0_i32_0 = arith.constant 0 : i32
    return %arg0, %c0_i32 : i32, i32
  }
  func.func @transform_1(%arg0: i32) -> (i32, i32) {
    %c0_i32 = arith.constant 0 : i32
    %c0_i32_0 = arith.constant 0 : i32
    return %c0_i32, %arg0 : i32, i32
  }
  func.func @transform_2(%arg0: i32) -> (i32, i32) {
    %c0_i32 = arith.constant 0 : i32
    %c0_i32_0 = arith.constant 0 : i32
    %c0_i32_1 = arith.constant 0 : i32
    return %c0_i32, %c0_i32_0 : i32, i32
  }
  func.func @transform_3(%arg0: i32) -> (i32, i32) {
    %c0_i32 = arith.constant 0 : i32
    %c0_i32_0 = arith.constant 0 : i32
    %c0_i32_1 = arith.constant 0 : i32
    return %c0_i32, %c0_i32_0 : i32, i32
  }
  func.func @transform_4(%arg0: i32) -> (i32, i32) {
    %c0_i32 = arith.constant 0 : i32
    %c0_i32_0 = arith.constant 0 : i32
    %c0_i32_1 = arith.constant 0 : i32
    return %c0_i32, %c0_i32_0 : i32, i32
  }
  func.func @transform_5(%arg0: i32) -> (i32, i32) {
    %c0_i32 = arith.constant 0 : i32
    %c0_i32_0 = arith.constant 0 : i32
    %c0_i32_1 = arith.constant 0 : i32
    return %c0_i32, %c0_i32_0 : i32, i32
  }
  func.func @transform_6(%arg0: i32) -> (i32, i32) {
    %c0_i32 = arith.constant 0 : i32
    %c0_i32_0 = arith.constant 0 : i32
    %c0_i32_1 = arith.constant 0 : i32
    return %c0_i32, %c0_i32_0 : i32, i32
  }
  func.func @transform_7(%arg0: i32) -> (i32, i32) {
    %c0_i32 = arith.constant 0 : i32
    %c0_i32_0 = arith.constant 0 : i32
    %c0_i32_1 = arith.constant 0 : i32
    return %c0_i32, %c0_i32_0 : i32, i32
  }
  func.func @transform_8(%arg0: i32) -> i32 {
    %c0_i32 = arith.constant 0 : i32
    %c0_i32_0 = arith.constant 0 : i32
    return %c0_i32 : i32
  }
  func.func @transform_9(%arg0: i32) -> (i32, i32) {
    %c0_i32 = arith.constant 0 : i32
    %c0_i32_0 = arith.constant 0 : i32
    return %c0_i32, %arg0 : i32, i32
  }
}

</mosaic_0001>

<bundles_post_ra>
// kernel: non_dominated_approximator_forward.1
= control target key start
LH: loop header
LB: loop body
LE: loop exit
PB: predicated region body
PF: predicated region fallthrough
CT: control target
= control target key end

     0   :  { %vm78_vm0 = vcmask 130048   ;;  %v666_v6 = vmov 0   ;;  %s889_s0 = inlined_call_operand.vmem [shape: f32[8,16], index: 0, kind: input, shape index: {}]   ;;  %s890_s1 = inlined_call_operand.vmem [shape: f32[1,8], index: 1, kind: input, shape index: {}]   ;;  %s891_s2 = inlined_call_operand.vmem [shape: f32[32,16], index: 2, kind: input, shape index: {}]   ;;  %s892_s3 = inlined_call_operand.vmem [shape: f32[32,1], index: 3, kind: input, shape index: {}]   ;;  %s893_s4 = inlined_call_operand.vmem [shape: f32[32,1], index: 4, kind: input, shape index: {}]   ;;  %s894_s5 = inlined_call_operand.vmem [shape: f32[32,1], index: 5, kind: input, shape index: {}]   ;;  %s895_s6 = inlined_call_operand.vmem [shape: f32[1,32], index: 6, kind: input, shape index: {}]   ;;  %s896_s7 = inlined_call_operand.vmem [shape: f32[1,32], index: 7, kind: input, shape index: {}]   ;;  %s897_s8 = inlined_call_operand.<no memory space> [shape: f32[1], index: 8, kind: input, shape index: {}]   ;;  %s898_s9 = inlined_call_operand.hbm [shape: f32[1,8], index: 9, kind: output, shape index: {}]  }
   0x1   :  { %v38_v0 = vld [vmem:[%s889_s0] sm:$0xff]  ;;  %v39_v1 = vld [vmem:[%s889_s0 + $0x8] sm:$0xff]  ;;  %v40_v2 = vld [vmem:[%s889_s0 + $0x10] sm:$0xff]  ;;  %641 = vset.pattern.permute.xlu1 %v666_v6  ;;  %640 = vset.pattern.permute.xlu0 %v666_v6 }
   0x2   :  { %v575_v3 = vpack.c.bf16 %v39_v1, %v38_v0  ;;  %vm732_vm1 = vmpackc.low %vm78_vm0, %vm78_vm0  ;;  %v41_v5 = vld [vmem:[%s889_s0 + $0x18] sm:$0xff]  ;;  %v34_v8 = vld [vmem:[%s891_s2] sm:$0xff] }
   0x3   :  { %v581_v7 = vpack.c.bf16 %v41_v5, %v40_v2  ;;  %v42_v9 = vld [vmem:[%s889_s0 + $0x20] sm:$0xff]  ;;  %v43_v10 = vld [vmem:[%s889_s0 + $0x28] sm:$0xff]  ;;  %547 = vmatprep.mubr.msk.f32.mxu0 %vm78_vm0, %v34_v8 }
   0x4   :  { %577 = vmatprep.subr.msk.bf16.mxu0 %vm732_vm1, %v575_v3  ;;  %v263_v11 = vld [vmem:[%s894_s5] sm:$0xff]  ;;  %v587_v13 = vpack.c.bf16 %v43_v10, %v42_v9  ;;  %v264_v14 = vld [vmem:[%s894_s5 + $0x8] sm:$0xff] }
   0x5   :  { %580 = vmatpush3.bf16.xpose.msk.msra.mxu0 %vm732_vm1, %v575_v3  ;;  %v228_v12 = vld [vmem:[%s893_s4] sm:$0xff]  ;;  %269 = vperm.xlu1 %641, %v263_v11   ;;  %v229_v15 = vld [vmem:[%s893_s4 + $0x8] sm:$0xff] }
   0x6   :  { %583 = vmatprep.subr.msk.bf16.mxu0 %vm732_vm1, %v581_v7  ;;  %235 = vperm.xlu0 %640, %v228_v12  }
   0x7   :  { %15 = vsyncpa [#allocation4], 0  ;;  %v231_v16 = vld [vmem:[%s893_s4 + $0x18] sm:$0xff]  ;;  %v44_v17 = vld [vmem:[%s889_s0 + $0x30] sm:$0xff]  ;;  %v667_v32 = vmov 0.0|0.0   ;;  %vm668_vm2 = vmmov 0  }
   0x8   :  { %v45_v18 = vld [vmem:[%s889_s0 + $0x38] sm:$0xff]  ;;  %v230_v19 = vld [vmem:[%s893_s4 + $0x10] sm:$0xff]  ;;  %v55_v23 = vld [vmem:[%s892_s3 + $0x8] sm:$0xff]  ;;  %623 = vmatprep.subr.bf16.mxu1 %v667_v32  ;;  %v669_v2 = vmov 0.0   ;;  %vm297_vm3 = vcmask 261120   ;;  %s670_s30 = smov [#allocation3]  }
   0x9   :  { %274 = vperm.xlu1 %641, %v264_v14   ;;  %v593_v20 = vpack.c.bf16 %v45_v18, %v44_v17  ;;  %v266_v21 = vld [vmem:[%s894_s5 + $0x18] sm:$0xff]  ;;  %v265_v22 = vld [vmem:[%s894_s5 + $0x10] sm:$0xff]  ;;  %v46_v24 = vld [vmem:[%s889_s0 + $0x40] sm:$0xff]  ;;  %561 = vmatprep.mubr.msk.f32.mxu1 %vm668_vm2, %v669_v2  ;;  %s454_s10 = sshll.u32 %s670_s30, 4  ;;  %s455_s10 = int_to_ptr.vmem [resolvable:$true] %s454_s10 }
   0xa   :  { %240 = vperm.xlu0 %640, %v229_v15   ;;  %v47_v25 = vld [vmem:[%s889_s0 + $0x48] sm:$0xff]  ;;  %v54_v26 = vld [vmem:[%s892_s3] sm:$0xff]  ;;  %v57_v28 = vld [vmem:[%s892_s3 + $0x18] sm:$0xff]  ;;  %s642_s11 = scalar_lea.vmem %s455_s10, 16  ;;  %s646_s12 = scalar_lea.vmem %s455_s10, 32 }
   0xb   :  { %v599_v27 = vpack.c.bf16 %v47_v25, %v46_v24  ;;  %v56_v29 = vld [vmem:[%s892_s3 + $0x10] sm:$0xff]  ;;  %v49_v31 = vld [vmem:[%s889_s0 + $0x58] sm:$0xff]  ;;  %v50_v34 = vld [vmem:[%s889_s0 + $0x60] sm:$0xff]  ;;  %p643_p0 = scmp.ne.s32.totalorder %s455_s10, %s642_s11  ;;  %p647_p1 = scmp.lt.s32.totalorder %s455_s10, %s455_s10 }
   0xc   :  { %v48_v30 = vld [vmem:[%s889_s0 + $0x50] sm:$0xff]  ;;  %v51_v35 = vld [vmem:[%s889_s0 + $0x68] sm:$0xff]  ;;  %v53_v38 = vld [vmem:[%s889_s0 + $0x78] sm:$0xff]  ;;  %p648_p2 = scmp.lt.s32.totalorder %s646_s12, %s642_s11 }
   0xd   :  { %586 = vmatpush3.bf16.xpose.msk.msra.mxu0 %vm732_vm1, %v581_v7  ;;  %250 = vperm.xlu1 %641, %v231_v16   ;;  %v605_v33 = vpack.c.bf16 %v49_v31, %v48_v30  ;;  %v611_v36 = vpack.c.bf16 %v51_v35, %v50_v34  ;;  %v52_v37 = vld [vmem:[%s889_s0 + $0x70] sm:$0xff]  ;;  %v35_v40 = vld [vmem:[%s891_s2 + $0x8] sm:$0xff]  ;;  %v37_v42 = vld [vmem:[%s891_s2 + $0x18] sm:$0xff] }
   0xe   :  { %589 = vmatprep.subr.msk.bf16.mxu0 %vm732_vm1, %v587_v13  ;;  %245 = vperm.xlu0 %640, %v230_v19   ;;  %v617_v39 = vpack.c.bf16 %v53_v38, %v52_v37  ;;  %v36_v41 = vld [vmem:[%s891_s2 + $0x10] sm:$0xff]  ;;  %v482_v43 = vld [vmem:[%s890_s1] ss:$0 sm:$0xff]  ;;  %p649_p3 = por %p648_p2, %p647_p1 }
   0xf   :  { %v296_v3 = vld [vmem:[%s896_s7] sm:$0x1] }
  0x10   :  { %p650_p4 = pnand %p649_p3, %p643_p0 }
  0x11   :  { %284 = vperm.xlu1 %641, %v266_v21  }
  0x12   :  { %279 = vperm.xlu0 %640, %v265_v22   ;;  %v295_v22 = vld [vmem:[%s895_s6] sm:$0x1] }
  0x15   :  { %592 = vmatpush3.bf16.xpose.msk.msra.mxu0 %vm732_vm1, %v587_v13  ;;  %65 = vperm.xlu1 %641, %v55_v23  }
  0x16   :  { %595 = vmatprep.subr.msk.bf16.mxu0 %vm732_vm1, %v593_v20  ;;  %60 = vperm.xlu0 %640, %v54_v26   ;;  %v445_v26 = vstv %s897_s8 }
  0x19   :  { %75 = vperm.xlu1 %641, %v57_v28  }
  0x1a   :  { %70 = vperm.xlu0 %640, %v56_v29  }
  0x1d   :  { %598 = vmatpush3.bf16.xpose.msk.msra.mxu0 %vm732_vm1, %v593_v20 }
  0x1e   :  { %601 = vmatprep.subr.msk.bf16.mxu0 %vm732_vm1, %v599_v27 }
  0x25   :  { %604 = vmatpush3.bf16.xpose.msk.msra.mxu0 %vm732_vm1, %v599_v27 }
  0x26   :  { %607 = vmatprep.subr.msk.bf16.mxu0 %vm732_vm1, %v605_v33 }
  0x2d   :  { %610 = vmatpush3.bf16.xpose.msk.msra.mxu0 %vm732_vm1, %v605_v33 }
  0x2e   :  { %613 = vmatprep.subr.msk.bf16.mxu0 %vm732_vm1, %v611_v36 }
  0x35   :  { %616 = vmatpush3.bf16.xpose.msk.msra.mxu0 %vm732_vm1, %v611_v36 }
  0x36   :  { %619 = vmatprep.subr.msk.bf16.mxu0 %vm732_vm1, %v617_v39 }
  0x3d   :  { %622 = vmatpush3.bf16.xpose.msk.msra.mxu0 %vm732_vm1, %v617_v39 }
  0x44   :  { %548 = vmatmul.mubr.msk.f32.vlgmr.msra.gmra.mrb[0].mxu0 %vm78_vm0, %v35_v40 }
  0x45   :  { %550 = vmatprep.mubr.msk.f32.mxu0 %vm78_vm0, %v36_v41 }
  0x48   :  { %551 = vmatmul.mubr.msk.f32.gmra.mrb[2].mxu0 %vm78_vm0, %v37_v42 }
  0x84   :  { %v270_v44 = vpop.permute.xlu1 %269 }
  0x85   :  { %v236_v45 = vpop.permute.xlu0 %235 }
  0x86   :  { %v259_v46 = vmul.f32 %v482_v43, %v236_v45 }
  0x88   :  { %v287_v47 = vadd.f32 %v270_v44, %v259_v46  ;;  %v275_v48 = vpop.permute.xlu1 %274 }
  0x89   :  { %v241_v49 = vpop.permute.xlu0 %240 }
  0x8a   :  { %v260_v50 = vmul.f32 %v482_v43, %v241_v49  ;;  %v291_v51 = vmax.f32 %v287_v47, 0.0 }
  0x8c   :  { %v288_v52 = vadd.f32 %v275_v48, %v260_v50  ;;  %v251_v53 = vpop.permute.xlu1 %250 }
  0x8d   :  { %v262_v54 = vmul.f32 %v482_v43, %v251_v53  ;;  %v246_v55 = vpop.permute.xlu0 %245 }
  0x8e   :  { %v292_v56 = vmax.f32 %v288_v52, 0.0  ;;  %v261_v57 = vmul.f32 %v482_v43, %v246_v55 }
  0x90   :  { %v285_v58 = vpop.permute.xlu1 %284  ;;  %v624_v59 = vpack.c.bf16 %v292_v56, %v291_v51 }
  0x91   :  { %v290_v60 = vadd.f32 %v285_v58, %v262_v54  ;;  %v280_v61 = vpop.permute.xlu0 %279 }
  0x92   :  { %v289_v62 = vadd.f32 %v280_v61, %v261_v57  ;;  %625 = vmatpush3.bf16.msra.mxu1 %v624_v59 }
  0x93   :  { %v294_v63 = vmax.f32 %v290_v60, 0.0  ;;  %626 = vmatprep.subr.bf16.mxu1 %v667_v32 }
  0x94   :  { %v293_v0 = vmax.f32 %v289_v62, 0.0  ;;  %v66_v4 = vpop.permute.xlu1 %65 }
  0x95   :  { %v61_v5 = vpop.permute.xlu0 %60 }
  0x96   :  { %v627_v1 = vpack.c.bf16 %v294_v63, %v293_v0 }
  0x98   :  { %628 = vmatpush3.bf16.msra.mxu1 %v627_v1  ;;  %v76_v11 = vpop.permute.xlu1 %75 }
  0x99   :  { %629 = vmatprep.subr.bf16.mxu1 %v667_v32  ;;  %v71_v14 = vpop.permute.xlu0 %70 }
  0x9b   :  { %562 = vmatmul.mubr.msk.f32.vlgmr.msra.gmra.mrb[0].mxu1 %vm297_vm3, %v296_v3 }
  0x9c   :  { %572 = vmatprep.mubr.msk.f32.mxu1 %vm668_vm2, %v669_v2 }
 0x117   :  { %v549_v6 = vpop.f32.mrb[0].mxu0 }
 0x118   :  { %v211_v7 = vadd.f32 %v549_v6, %v66_v4  ;;  %v205_v8 = vpop.f32.mrb[1].mxu0 }
 0x119   :  { %v206_v9 = vadd.f32 %v205_v8, %v61_v5 }
 0x11a   :  { %v225_v10 = vmax.f32 %v211_v7, 0.0 }
 0x11b   :  { %v224_v12 = vmax.f32 %v206_v9, 0.0  ;;  %v552_v13 = vpop.f32.mrb[2].mxu0 }
 0x11c   :  { %v221_v15 = vadd.f32 %v552_v13, %v76_v11  ;;  %v215_v16 = vpop.f32.mrb[3].mxu0 }
 0x11d   :  { %v630_v17 = vpack.c.bf16 %v225_v10, %v224_v12  ;;  %v216_v18 = vadd.f32 %v215_v16, %v71_v14 }
 0x11e   :  { %v227_v19 = vmax.f32 %v221_v15, 0.0 }
 0x11f   :  { %v226_v20 = vmax.f32 %v216_v18, 0.0  ;;  %631 = vmatpush3.bf16.msra.mxu1 %v630_v17 }
 0x120   :  { %632 = vmatprep.subr.bf16.mxu1 %v667_v32 }
 0x121   :  { %v633_v21 = vpack.c.bf16 %v227_v19, %v226_v20 }
 0x123   :  { %634 = vmatpush3.bf16.msra.mxu1 %v633_v21 }
 0x126   :  { %573 = vmatmul.mubr.msk.f32.vlgmr.msra.gmra.mrb[2].mxu1 %vm297_vm3, %v295_v22 }
 0x16e   :  { %v367_v23 = vpop.f32.mrb[0].mxu1 }
 0x16f   :  { %v563_v24 = vpop.f32.mrb[1].mxu1 }
 0x1f9   :  { %v440_v25 = vpop.f32.mrb[2].mxu1 }
 0x1fa   :  { %v441_v27 = vadd.f32 %v440_v25, %v367_v23  ;;  %v574_v28 = vpop.f32.mrb[3].mxu1 }
 0x1fc   :  { %v446_v29 = vadd.f32 %v445_v26, %v441_v27 }
 0x1fe   :  { %447 = vst [vmem:[#allocation3] sm:$0x1] %v446_v29 }
 0x1ff   :  { %653 = shalt.err (!%p650_p4)
}
 0x200   :  { %s654_s14 = scalar_lea.hbm %s898_s9, 16 }
 0x201   :  { %p655_p5 = scmp.ne.s32.totalorder %s898_s9, %s654_s14  ;;  %p658_p6 = scmp.lt.u32.totalorder %s654_s14, %s898_s9 }
 0x203   :  { %p660_p7 = pnand %p658_p6, %p655_p5 }
 0x205   :  { %663 = shalt.err (!%p660_p7)
}
 0x206   :  { %457 = dma.vmem_to_hbm [thread:$0]  %s455_s10, 16, %s898_s9, [#allocation4]  }
 0x207   :  { %664 = dma.done.wait [#allocation4], 16  }
 0x208   :  { %665 = vsyncadd [#allocation4], 4294967280 }
 0x209   :  { %461 = vsyncpa [#allocation4], 1 }

</bundles_post_ra>
